<compile_context>
chip_gen: v5e
topology: v5e:2x2
jax: 0.10.0
libtpu: 0.0.40
codegen_flags: <defaults>
</compile_context>

<pallas_src>
import functools

import jax
import jax.numpy as jnp
from jax import lax
from jax.experimental import pallas as pl
from jax.experimental.pallas import tpu as pltpu

_LANE = 128


def _build_weight_table(B, T, D, velocity_dim):
    """[T, D] f32 weights folding MSE means, 10/20/20 factors, *3, frame-0 mask."""
    t_idx = jnp.arange(T, dtype=jnp.int32)[:, None]
    d_idx = jnp.arange(D, dtype=jnp.int32)[None, :]
    w = jnp.zeros((T, D), jnp.float32)
    if T > 2:  # middle frames 1 .. T-2
        w = w + jnp.where((t_idx >= 1) & (t_idx <= T - 2),
                          10.0 / (B * (T - 2) * D), 0.0)
    # last frame
    w = w + jnp.where(t_idx == T - 1, 20.0 / (B * D), 0.0)
    # first frame, features [0, D - velocity_dim)
    keep = D - velocity_dim
    if keep > 0:
        w = w + jnp.where((t_idx == 0) & (d_idx < keep), 20.0 / (B * keep), 0.0)
    return (w * 3.0).astype(jnp.float32)


def _choose_tiles(B, C, itemsize, budget_bytes=6 << 20):
    """Pick (row_tile, col_tile, need_row_mask) for the flattened (B, C) views.

    2 streamed inputs x 2 pipeline buffers x block stays ~<= 24 MiB
    (vmem_limit_bytes is raised to 32 MiB).  Sublane tiles are dtype-aware and
    ragged batch edges are handled with an in-kernel mask, not smaller tiles.
    """
    sub = 8 * max(1, 4 // itemsize)        # 8 rows f32, 16 bf16, 32 int8/fp8
    # ---- column (lane) tile: multiple of 128 when possible, else full extent.
    if C % _LANE != 0:
        tC = C
    else:
        max_cols = max(_LANE, (budget_bytes // (sub * itemsize)) // _LANE * _LANE)
        if C <= max_cols:
            tC = C
        else:
            tC = _LANE
            cand = max_cols
            while cand >= _LANE:
                if C % cand == 0:
                    tC = cand
                    break
                cand -= _LANE
    # ---- row (sublane) tile.
    if B < 8:
        return B, tC, False                # tiny batch: full extent, no mask
    max_rows = max(sub, (budget_bytes // (tC * itemsize)) // sub * sub)
    tB = min(-(-B // sub) * sub, max_rows)  # round_up(B, sub), budget-capped
    return tB, tC, (B % tB) != 0


def _make_kernel(B, tB, tC, P, need_mask):
    """Per-grid-cell partial: out[b, c] = fold_to_(P,128)( W * (pre - gt)^2 )."""

    def kernel(pre_ref, gt_ref, w_ref, out_ref):
        p = pre_ref[...].astype(jnp.float32)           # (tB, tC)
        g = gt_ref[...].astype(jnp.float32)
        d = p - g
        d2 = d * d
        if need_mask:                                  # ragged batch edge
            row0 = pl.program_id(0) * tB
            rows = lax.broadcasted_iota(jnp.int32, (tB, 1), 0) + row0
            d2 = jnp.where(rows < B, d2, 0.0)          # where => NaN-safe
        # Fold rows down to P (<= 8) sublanes: 8-aligned slices, pure VALU adds.
        acc = d2[:P, :]
        for gix in range(1, tB // P):
            acc = acc + d2[gix * P:(gix + 1) * P, :]
        # Apply the per-column weight once on the folded (P, tC) partial.
        acc = acc * w_ref[...]                         # (P, tC) * (1, tC)
        # Fold columns down to one 128-lane width: 128-aligned VALU adds.
        padc = (-tC) % _LANE
        if padc:                                       # C not a multiple of 128
            acc = jnp.concatenate(
                [acc, jnp.zeros((P, padc), jnp.float32)], axis=1)
        out = acc[:, :_LANE]
        for gix in range(1, (tC + padc) // _LANE):
            out = out + acc[:, gix * _LANE:(gix + 1) * _LANE]
        out_ref[0, 0] = out                            # (P, 128) partial

    return kernel


@functools.partial(jax.jit, static_argnames="velocity_dim")
def reconstruction_loss(pre_seq, gt_seq, *, velocity_dim):
    assert pre_seq.shape == gt_seq.shape and pre_seq.ndim == 3
    B, T, D = pre_seq.shape
    C = T * D

    # Free contiguous reshape: each sample's (T, D) block becomes one lane-dense
    # row; the weight is a single (1, C) row broadcast over batch rows.
    pre2 = pre_seq.reshape(B, C)
    gt2 = gt_seq.reshape(B, C)
    w2 = _build_weight_table(B, T, D, velocity_dim).reshape(1, C)

    itemsize = pre_seq.dtype.itemsize
    tB, tC, need_mask = _choose_tiles(B, C, itemsize)
    P = min(tB, 8)
    Gb = pl.cdiv(B, tB)
    Gc = C // tC

    cost = pl.CostEstimate(
        flops=4 * B * C,
        transcendentals=0,
        bytes_accessed=int(2 * B * C * itemsize + 4 * C
                           + 4 * Gb * Gc * P * _LANE),
    )

    partials = pl.pallas_call(
        _make_kernel(B, tB, tC, P, need_mask),
        out_shape=jax.ShapeDtypeStruct((Gb, Gc, P, _LANE), jnp.float32),
        grid_spec=pltpu.PrefetchScalarGridSpec(
            num_scalar_prefetch=0,
            grid=(Gb, Gc),
            in_specs=[
                pl.BlockSpec((tB, tC), lambda b, c: (b, c)),   # pre
                pl.BlockSpec((tB, tC), lambda b, c: (b, c)),   # gt
                pl.BlockSpec((1, tC), lambda b, c: (0, c)),    # weights (tiny)
            ],
            out_specs=pl.BlockSpec((1, 1, P, _LANE), lambda b, c: (b, c, 0, 0)),
        ),
        compiler_params=pltpu.CompilerParams(
            dimension_semantics=("parallel", "parallel"),   # megacore on v7x
            vmem_limit_bytes=32 * 1024 * 1024),
        cost_estimate=cost,
    )(pre2, gt2, w2)

    # Tiny final reduction over the per-tile partials.
    return jnp.sum(partials)


def reconstruction_loss_ref(pre_seq, gt_seq, *, velocity_dim):
    """Pure-JAX reference mirroring the PyTorch forward."""
    mse = lambda a, b: jnp.mean((a.astype(jnp.float32) - b.astype(jnp.float32)) ** 2)
    rec = (mse(pre_seq[:, 1:-1, :], gt_seq[:, 1:-1, :]) * 10.0
           + mse(pre_seq[:, -1, :], gt_seq[:, -1, :]) * 20.0
           + mse(pre_seq[:, 0, :-velocity_dim], gt_seq[:, 0, :-velocity_dim]) * 20.0)
    return rec * 3.0


if __name__ == "__main__":
    # Small deterministic config: B=2, T=8 frames, D=32 features, velocity_dim=4.
    B, T, D = 2, 8, 32
    VELOCITY_DIM = 4

    key = jax.random.PRNGKey(0)
    k1, k2 = jax.random.split(key)
    pre_seq = jax.random.normal(k1, (B, T, D), dtype=jnp.float32)
    gt_seq = jax.random.normal(k2, (B, T, D), dtype=jnp.float32)

    loss = reconstruction_loss(pre_seq, gt_seq, velocity_dim=VELOCITY_DIM)
    loss = jax.block_until_ready(loss)

    ref = reconstruction_loss_ref(pre_seq, gt_seq, velocity_dim=VELOCITY_DIM)
    ref = jax.block_until_ready(ref)

    assert jnp.allclose(loss, ref, rtol=1e-5, atol=1e-5), (loss, ref)
    print("KERNEL_OK")
</pallas_src>

<mosaic_0001>
module attributes {stable_mosaic.version = 11 : i64} {
  func.func @kernel(%arg0: i32, %arg1: i32, %arg2: memref<2x256xf32, #tpu.memory_space<vmem>>, %arg3: memref<2x256xf32, #tpu.memory_space<vmem>>, %arg4: memref<1x256xf32, #tpu.memory_space<vmem>>, %arg5: memref<1x1x2x128xf32, #tpu.memory_space<vmem>>) attributes {dimension_semantics = [#tpu.dimension_semantics<parallel>, #tpu.dimension_semantics<parallel>], iteration_bounds = array<i64: 1, 1>, scalar_prefetch = 0 : i64, scratch_operands = 0 : i64, tpu.core_type = #tpu.core_type<tc>, window_params = [{transform_indices = @transform_0, window_bounds = array<i64: 2, 256>}, {transform_indices = @transform_1, window_bounds = array<i64: 2, 256>}, {transform_indices = @transform_2, window_bounds = array<i64: 1, 256>}, {transform_indices = @transform_3, window_bounds = array<i64: 1, 1, 2, 128>}]} {
    %c0 = arith.constant 0 : index
    %c0_0 = arith.constant 0 : index
    %0 = vector.load %arg2[%c0, %c0_0] : memref<2x256xf32, #tpu.memory_space<vmem>>, vector<2x256xf32>
    %c0_1 = arith.constant 0 : index
    %c0_2 = arith.constant 0 : index
    %1 = vector.load %arg3[%c0_1, %c0_2] : memref<2x256xf32, #tpu.memory_space<vmem>>, vector<2x256xf32>
    %2 = arith.subf %0, %1 : vector<2x256xf32>
    %3 = arith.mulf %2, %2 : vector<2x256xf32>
    %c0_3 = arith.constant 0 : index
    %c0_4 = arith.constant 0 : index
    %4 = vector.load %arg4[%c0_3, %c0_4] : memref<1x256xf32, #tpu.memory_space<vmem>>, vector<1x256xf32>
    %5 = vector.broadcast %4 : vector<1x256xf32> to vector<2x256xf32>
    %6 = arith.mulf %3, %5 : vector<2x256xf32>
    %7 = vector.extract_strided_slice %6 {offsets = [0, 0], sizes = [2, 128], strides = [1, 1]} : vector<2x256xf32> to vector<2x128xf32>
    %8 = vector.extract_strided_slice %6 {offsets = [0, 128], sizes = [2, 128], strides = [1, 1]} : vector<2x256xf32> to vector<2x128xf32>
    %9 = arith.addf %7, %8 : vector<2x128xf32>
    %c0_5 = arith.constant 0 : index
    %c0_6 = arith.constant 0 : index
    %c0_7 = arith.constant 0 : index
    %c0_8 = arith.constant 0 : index
    %10 = vector.load %arg5[%c0_5, %c0_6, %c0_7, %c0_8] : memref<1x1x2x128xf32, #tpu.memory_space<vmem>>, vector<1x1x2x128xf32>
    %11 = vector.shape_cast %10 : vector<1x1x2x128xf32> to vector<2x128xf32>
    %12 = vector.shape_cast %9 : vector<2x128xf32> to vector<1x1x2x128xf32>
    tpu.vector_store %arg5[%c0_5, %c0_6, %c0_7, %c0_8], %12 {strides = array<i32>} : memref<1x1x2x128xf32, #tpu.memory_space<vmem>>, vector<1x1x2x128xf32>,
    return
  }
  func.func @transform_0(%arg0: i32, %arg1: i32) -> (i32, i32) {
    %c0_i32 = arith.constant 0 : i32
    return %arg0, %arg1 : i32, i32
  }
  func.func @transform_1(%arg0: i32, %arg1: i32) -> (i32, i32) {
    %c0_i32 = arith.constant 0 : i32
    return %arg0, %arg1 : i32, i32
  }
  func.func @transform_2(%arg0: i32, %arg1: i32) -> (i32, i32) {
    %c0_i32 = arith.constant 0 : i32
    %c0_i32_0 = arith.constant 0 : i32
    return %c0_i32, %arg1 : i32, i32
  }
  func.func @transform_3(%arg0: i32, %arg1: i32) -> (i32, i32, i32, i32) {
    %c0_i32 = arith.constant 0 : i32
    %c0_i32_0 = arith.constant 0 : i32
    %c0_i32_1 = arith.constant 0 : i32
    return %arg0, %arg1, %c0_i32, %c0_i32_0 : i32, i32, i32, i32
  }
}

</mosaic_0001>

<bundles_post_ra>
// kernel: reconstruction_loss.1
= control target key start
LH: loop header
LB: loop body
LE: loop exit
PB: predicated region body
PF: predicated region fallthrough
CT: control target
= control target key end

     0   :  { %vm23_vm0 = vcmask 1041408   ;;  %s68_s0 = inlined_call_operand.vmem [shape: f32[2,256], index: 0, kind: input, shape index: {}]   ;;  %s69_s1 = inlined_call_operand.vmem [shape: f32[2,256], index: 1, kind: input, shape index: {}]   ;;  %s70_s2 = inlined_call_operand.vmem [shape: f32[1,256], index: 2, kind: input, shape index: {}]   ;;  %s71_s3 = inlined_call_operand.vmem [shape: f32[1,1,2,128], index: 3, kind: output, shape index: {}]  }
   0x1   :  { %v14_v0 = vld [vmem:[%s68_s0] sm:$0xf] }
   0x2   :  { %v15_v1 = vld [vmem:[%s69_s1] sm:$0xf] }
   0x3   :  { %v18_v2 = vld [vmem:[%s70_s2] sm:$0x3]  ;;  %v16_v3 = vsub.f32 %v14_v0, %v15_v1 }
   0x4   :  { %v20_v4 = vperm.slane %v18_v2, 0  ;;  %v21_v5 = vperm.slane %v18_v2, 1 }
   0x5   :  { %v17_v6 = vmul.f32 %v16_v3, %v16_v3 }
   0x6   :  { %v22_v7 = vrot.slane %v21_v5, 6 }
   0x8   :  { %v24_v8 = vsel %vm23_vm0, %v20_v4, %v22_v7 }
   0x9   :  { %v26_v9 = vmul.f32 %v24_v8, %v17_v6 }
   0xb   :  { %v28_v10 = vrot.slane %v26_v9, 2 }
   0xd   :  { %v30_v11 = vadd.f32 %v28_v10, %v26_v9 }
   0xf   :  { %31 = vst [vmem:[%s71_s3] sm:$0x3] %v30_v11 }

</bundles_post_ra>
